<compile_context>
chip_gen: v7x
topology: tpu7x:2x2x1
jax: 0.10.0
libtpu: 0.0.40
codegen_flags: <defaults>
</compile_context>

<pallas_src>
import jax
import jax.numpy as jnp
from jax.experimental import pallas as pl
from jax.experimental.pallas import tpu as pltpu


LN_EPS = 1e-5                      # torch.nn.LayerNorm default
_INV_SQRT2 = 0.7071067811865476    # 1/sqrt(2) for exact-erf GELU


def _round_up(x, m):
    return ((x + m - 1) // m) * m


def _vmem_capacity_bytes():
    try:
        return int(pltpu.get_tpu_info().vmem_capacity_bytes)
    except Exception:
        return 64 * 1024 * 1024    # conservative default (v7x per-TensorCore)


# --------------------------------------------------------------------------
# Kernel A: weights fully VMEM-resident (no inner grid axis).
# --------------------------------------------------------------------------
def _ffn_kernel_resident(x_ref, gamma_ref, beta_ref, w1_ref, b1_ref, w2_ref,
                         b2_ref, o_ref):
    # LayerNorm in f32.
    x = x_ref[...].astype(jnp.float32)                           # (TM, dim)
    mu = jnp.mean(x, axis=-1, keepdims=True)
    var = jnp.mean((x - mu) * (x - mu), axis=-1, keepdims=True)
    y = (x - mu) * jax.lax.rsqrt(var + LN_EPS) * gamma_ref[...] + beta_ref[...]

    # Linear(dim -> inner): bf16 operands, f32 MXU accumulation.
    h = jnp.dot(y.astype(jnp.bfloat16), w1_ref[...],
                preferred_element_type=jnp.float32)              # (TM, inner)
    h = h + b1_ref[...]

    # GELU (exact erf form; matches torch.nn.GELU default).
    h = 0.5 * h * (1.0 + jax.lax.erf(h * _INV_SQRT2))
    # Dropout(p=0.0) is the identity -> no-op.

    # Linear(inner -> dim).
    out = jnp.dot(h.astype(jnp.bfloat16), w2_ref[...],
                  preferred_element_type=jnp.float32)            # (TM, dim)
    o_ref[...] = (out + b2_ref[...]).astype(o_ref.dtype)
    # Dropout(p=0.0) is the identity -> no-op.


# --------------------------------------------------------------------------
# Kernel B: weights streamed block-by-block along the inner dimension.
# --------------------------------------------------------------------------
def _ffn_kernel_streamed(x_ref, gamma_ref, beta_ref, w1_ref, b1_ref, w2_ref,
                         b2_ref, o_ref, y_scratch, acc_scratch):
    k = pl.program_id(1)
    nk = pl.num_programs(1)

    # Once per row tile: LayerNorm (f32) -> cache bf16 result.
    @pl.when(k == 0)
    def _():
        x = x_ref[...].astype(jnp.float32)                       # (TM, dim)
        mu = jnp.mean(x, axis=-1, keepdims=True)
        var = jnp.mean((x - mu) * (x - mu), axis=-1, keepdims=True)
        xhat = (x - mu) * jax.lax.rsqrt(var + LN_EPS)
        y = xhat * gamma_ref[...] + beta_ref[...]
        y_scratch[...] = y.astype(jnp.bfloat16)

    # Linear(dim -> inner) block + GELU.
    h = jnp.dot(y_scratch[...], w1_ref[...],
                preferred_element_type=jnp.float32)              # (TM, TK)
    h = h + b1_ref[...]
    h = 0.5 * h * (1.0 + jax.lax.erf(h * _INV_SQRT2))
    # Dropout(p=0.0) is the identity -> no-op.

    # Linear(inner -> dim) partial product, f32 accumulation.
    part = jnp.dot(h.astype(jnp.bfloat16), w2_ref[...],
                   preferred_element_type=jnp.float32)           # (TM, dim)

    @pl.when(k == 0)
    def _():
        acc_scratch[...] = part                                  # no zero-init+add

    @pl.when(k > 0)
    def _():
        acc_scratch[...] += part

    # Finalize: second bias, cast, lane-dense full-dim store.
    @pl.when(k == nk - 1)
    def _():
        o_ref[...] = (acc_scratch[...] + b2_ref[...]).astype(o_ref.dtype)
    # Dropout(p=0.0) is the identity -> no-op.


# --------------------------------------------------------------------------
# Host-side parameter prep (hoisted out of the per-call path).
# --------------------------------------------------------------------------
def prepare_ffn_params(gamma, beta, w1, b1, w2, b2, *, tk=1024):
    """Pad the inner dim to a tile multiple and cast weights to bf16, once."""
    dim, inner = w1.shape
    tk_eff = min(tk, _round_up(inner, 128))
    inner_pad = _round_up(inner, tk_eff)
    if inner_pad != inner:
        # Exact: b1 pad is 0 -> GELU(0)=0, and w2's padded rows are 0.
        w1 = jnp.pad(w1, ((0, 0), (0, inner_pad - inner)))
        b1 = jnp.pad(b1, ((0, inner_pad - inner),))
        w2 = jnp.pad(w2, ((0, inner_pad - inner), (0, 0)))
    return {
        "dim": dim, "inner": inner, "inner_pad": inner_pad, "tk": tk_eff,
        "gamma": gamma.reshape(1, dim).astype(jnp.float32),
        "beta": beta.reshape(1, dim).astype(jnp.float32),
        "w1": w1.astype(jnp.bfloat16),
        "b1": b1.reshape(1, inner_pad).astype(jnp.float32),
        "w2": w2.astype(jnp.bfloat16),
        "b2": b2.reshape(1, dim).astype(jnp.float32),
    }


def feed_forward(x, params, *, tm=512):
    """x: (..., dim) -> (..., dim). Fused LN + MLP in one Pallas kernel."""
    dim = params["dim"]
    inner_pad = params["inner_pad"]
    tk = params["tk"]
    gamma, beta = params["gamma"], params["beta"]
    w1, b1, w2, b2 = params["w1"], params["b1"], params["w2"], params["b2"]

    lead = x.shape[:-1]
    rows = 1
    for d in lead:
        rows *= d
    x2 = x.reshape(rows, dim)

    # ---- row tiling: 8-aligned; >=2 row tiles when possible (v7x megacore) ----
    tm_eff = min(tm, _round_up(rows, 8))
    if rows > 8 and _round_up(rows, tm_eff) // tm_eff < 2:
        tm_eff = max(8, _round_up(_round_up(rows, 8) // 2, 8))
    rows_pad = _round_up(rows, tm_eff)
    if rows_pad != rows:
        x2 = jnp.pad(x2, ((0, rows_pad - rows), (0, 0)))
    n_row = rows_pad // tm_eff

    # ---- generation-aware VMEM budgeting ----
    capacity = _vmem_capacity_bytes()
    budget = int(0.70 * capacity)
    vmem_limit = int(0.85 * capacity)
    xb = x2.dtype.itemsize
    ob = xb  # output dtype == input dtype

    # Full bf16 weights (double-buffered by the pipeliner) + one row tile's
    # activations / temporaries.
    w_resident_bytes = 2 * (dim * inner_pad * 2 + inner_pad * dim * 2)
    act_bytes = (2 * tm_eff * dim * xb + 2 * tm_eff * dim * ob
                 + tm_eff * inner_pad * 4 + tm_eff * dim * 6)
    resident = (w_resident_bytes + act_bytes) <= budget

    cparams_kw = dict(vmem_limit_bytes=vmem_limit)

    if resident:
        out = pl.pallas_call(
            _ffn_kernel_resident,
            out_shape=jax.ShapeDtypeStruct((rows_pad, dim), x.dtype),
            grid_spec=pltpu.PrefetchScalarGridSpec(
                num_scalar_prefetch=0,
                grid=(n_row,),
                in_specs=[
                    pl.BlockSpec((tm_eff, dim), lambda i: (i, 0)),      # x rows
                    pl.BlockSpec((1, dim), lambda i: (0, 0)),           # gamma
                    pl.BlockSpec((1, dim), lambda i: (0, 0)),           # beta
                    pl.BlockSpec((dim, inner_pad), lambda i: (0, 0)),   # w1 (resident)
                    pl.BlockSpec((1, inner_pad), lambda i: (0, 0)),     # b1
                    pl.BlockSpec((inner_pad, dim), lambda i: (0, 0)),   # w2 (resident)
                    pl.BlockSpec((1, dim), lambda i: (0, 0)),           # b2
                ],
                out_specs=pl.BlockSpec((tm_eff, dim), lambda i: (i, 0)),
            ),
            compiler_params=pltpu.CompilerParams(
                dimension_semantics=("parallel",), **cparams_kw),
        )(x2, gamma, beta, w1, b1, w2, b2)
    else:
        # Streamed weights: largest tk block (multiple of 128, divisor of
        # inner_pad) whose per-step footprint fits the budget.
        def step_bytes(tk_):
            return (8 * dim * tk_                             # w1+w2 blocks, bf16, x2 bufs
                    + 2 * tm_eff * dim * xb + 2 * tm_eff * dim * ob
                    + tm_eff * dim * 6                        # y(bf16)+acc(f32) scratch
                    + tm_eff * tk_ * 4)                       # h temp (f32)

        cands = [c for c in range(tk, 127, -128) if inner_pad % c == 0]
        tk_eff = cands[-1]
        for c in cands:
            if step_bytes(c) <= budget:
                tk_eff = c
                break
        nk = inner_pad // tk_eff

        out = pl.pallas_call(
            _ffn_kernel_streamed,
            out_shape=jax.ShapeDtypeStruct((rows_pad, dim), x.dtype),
            grid_spec=pltpu.PrefetchScalarGridSpec(
                num_scalar_prefetch=0,
                grid=(n_row, nk),
                in_specs=[
                    pl.BlockSpec((tm_eff, dim), lambda i, k: (i, 0)),   # x rows
                    pl.BlockSpec((1, dim), lambda i, k: (0, 0)),        # gamma
                    pl.BlockSpec((1, dim), lambda i, k: (0, 0)),        # beta
                    pl.BlockSpec((dim, tk_eff), lambda i, k: (0, k)),   # w1 block
                    pl.BlockSpec((1, tk_eff), lambda i, k: (0, k)),     # b1 block
                    pl.BlockSpec((tk_eff, dim), lambda i, k: (k, 0)),   # w2 block
                    pl.BlockSpec((1, dim), lambda i, k: (0, 0)),        # b2
                ],
                out_specs=pl.BlockSpec((tm_eff, dim), lambda i, k: (i, 0)),
                scratch_shapes=[
                    pltpu.VMEM((tm_eff, dim), jnp.bfloat16),   # cached LN output
                    pltpu.VMEM((tm_eff, dim), jnp.float32),    # output accumulator
                ],
            ),
            compiler_params=pltpu.CompilerParams(
                dimension_semantics=("parallel", "arbitrary"), **cparams_kw),
        )(x2, gamma, beta, w1, b1, w2, b2)

    if rows_pad != rows:
        out = out[:rows]
    return out.reshape(*lead, dim)


# --------------------------------------------------------------------------
# Parameter init + pure-JAX reference.
# --------------------------------------------------------------------------
def init_params(key, dim, mult=4, dtype=jnp.float32):
    inner = int(dim * mult)
    k1, k2, k3, k4 = jax.random.split(key, 4)
    gamma = jnp.ones((dim,), dtype)                     # LayerNorm weight
    beta = jnp.zeros((dim,), dtype)                     # LayerNorm bias
    w1 = jax.random.uniform(k1, (dim, inner), dtype, -1.0, 1.0) / jnp.sqrt(dim)
    b1 = jax.random.uniform(k2, (inner,), dtype, -1.0, 1.0) / jnp.sqrt(dim)
    w2 = jax.random.uniform(k3, (inner, dim), dtype, -1.0, 1.0) / jnp.sqrt(inner)
    b2 = jax.random.uniform(k4, (dim,), dtype, -1.0, 1.0) / jnp.sqrt(inner)
    return gamma, beta, w1, b1, w2, b2


def _reference(x, gamma, beta, w1, b1, w2, b2):
    # Mirrors torch semantics with the same bf16-operand / f32-accumulation
    # matmul policy as the kernel.
    lead, dim = x.shape[:-1], x.shape[-1]
    x2 = x.reshape(-1, dim).astype(jnp.float32)
    mu = jnp.mean(x2, axis=-1, keepdims=True)
    var = jnp.mean((x2 - mu) ** 2, axis=-1, keepdims=True)
    y = (x2 - mu) * jax.lax.rsqrt(var + LN_EPS) * gamma + beta
    h = jnp.dot(y.astype(jnp.bfloat16), w1.astype(jnp.bfloat16),
                preferred_element_type=jnp.float32) + b1
    h = 0.5 * h * (1.0 + jax.lax.erf(h * _INV_SQRT2))
    out = jnp.dot(h.astype(jnp.bfloat16), w2.astype(jnp.bfloat16),
                  preferred_element_type=jnp.float32) + b2
    return out.reshape(*lead, dim).astype(x.dtype)


if __name__ == "__main__":
    batch, seq, dim, mult = 2, 8, 32, 4   # inner_dim = 128

    key = jax.random.PRNGKey(0)
    kx, kp = jax.random.split(key)
    x = jax.random.normal(kx, (batch, seq, dim), jnp.float32)
    raw_params = init_params(kp, dim, mult)

    # Weight cast/pad hoisted out of the call path (done once).
    params = prepare_ffn_params(*raw_params)

    out = feed_forward(x, params)
    out = jax.block_until_ready(out)

    ref = _reference(x, *raw_params)
    assert out.shape == (batch, seq, dim)
    assert jnp.allclose(out, ref, atol=2e-3, rtol=2e-3), "mismatch vs reference"

    print("KERNEL_OK")
</pallas_src>

<mosaic_0001>
module attributes {stable_mosaic.version = 11 : i64} {
  func.func @_ffn_kernel_resident(%arg0: i32, %arg1: memref<8x32xf32, #tpu.memory_space<vmem>>, %arg2: memref<1x32xf32, #tpu.memory_space<vmem>>, %arg3: memref<1x32xf32, #tpu.memory_space<vmem>>, %arg4: memref<32x128xbf16, #tpu.memory_space<vmem>>, %arg5: memref<1x128xf32, #tpu.memory_space<vmem>>, %arg6: memref<128x32xbf16, #tpu.memory_space<vmem>>, %arg7: memref<1x32xf32, #tpu.memory_space<vmem>>, %arg8: memref<8x32xf32, #tpu.memory_space<vmem>>) attributes {dimension_semantics = [#tpu.dimension_semantics<parallel>], iteration_bounds = array<i64: 2>, scalar_prefetch = 0 : i64, scratch_operands = 0 : i64, tpu.core_type = #tpu.core_type<tc>, window_params = [{transform_indices = @transform_0, window_bounds = array<i64: 8, 32>}, {pipeline_mode = #tpu.pipeline_mode<synchronous>, transform_indices = @transform_1, window_bounds = array<i64: 1, 32>}, {pipeline_mode = #tpu.pipeline_mode<synchronous>, transform_indices = @transform_2, window_bounds = array<i64: 1, 32>}, {pipeline_mode = #tpu.pipeline_mode<synchronous>, transform_indices = @transform_3, window_bounds = array<i64: 32, 128>}, {pipeline_mode = #tpu.pipeline_mode<synchronous>, transform_indices = @transform_4, window_bounds = array<i64: 1, 128>}, {pipeline_mode = #tpu.pipeline_mode<synchronous>, transform_indices = @transform_5, window_bounds = array<i64: 128, 32>}, {pipeline_mode = #tpu.pipeline_mode<synchronous>, transform_indices = @transform_6, window_bounds = array<i64: 1, 32>}, {transform_indices = @transform_7, window_bounds = array<i64: 8, 32>}]} {
    %c0 = arith.constant 0 : index
    %c0_0 = arith.constant 0 : index
    %0 = vector.load %arg1[%c0, %c0_0] : memref<8x32xf32, #tpu.memory_space<vmem>>, vector<8x32xf32>
    %cst = arith.constant dense<0.000000e+00> : vector<8xf32>
    %1 = vector.multi_reduction <add>, %0, %cst [1] : vector<8x32xf32> to vector<8xf32>
    %2 = vector.shape_cast %1 : vector<8xf32> to vector<8x1xf32>
    %cst_1 = arith.constant 3.200000e+01 : f32
    %3 = vector.broadcast %cst_1 : f32 to vector<8x1xf32>
    %4 = arith.divf %2, %3 : vector<8x1xf32>
    %5 = vector.broadcast %4 : vector<8x1xf32> to vector<8x32xf32>
    %6 = arith.subf %0, %5 : vector<8x32xf32>
    %7 = vector.broadcast %4 : vector<8x1xf32> to vector<8x32xf32>
    %8 = arith.subf %0, %7 : vector<8x32xf32>
    %9 = arith.mulf %6, %8 : vector<8x32xf32>
    %cst_2 = arith.constant dense<0.000000e+00> : vector<8xf32>
    %10 = vector.multi_reduction <add>, %9, %cst_2 [1] : vector<8x32xf32> to vector<8xf32>
    %11 = vector.shape_cast %10 : vector<8xf32> to vector<8x1xf32>
    %cst_3 = arith.constant 3.200000e+01 : f32
    %12 = vector.broadcast %cst_3 : f32 to vector<8x1xf32>
    %13 = arith.divf %11, %12 : vector<8x1xf32>
    %14 = vector.broadcast %4 : vector<8x1xf32> to vector<8x32xf32>
    %15 = arith.subf %0, %14 : vector<8x32xf32>
    %cst_4 = arith.constant 9.99999974E-6 : f32
    %16 = vector.broadcast %cst_4 : f32 to vector<8x1xf32>
    %17 = arith.addf %13, %16 : vector<8x1xf32>
    %18 = math.rsqrt %17 : vector<8x1xf32>
    %19 = vector.broadcast %18 : vector<8x1xf32> to vector<8x32xf32>
    %20 = arith.mulf %15, %19 : vector<8x32xf32>
    %c0_5 = arith.constant 0 : index
    %c0_6 = arith.constant 0 : index
    %21 = vector.load %arg2[%c0_5, %c0_6] : memref<1x32xf32, #tpu.memory_space<vmem>>, vector<1x32xf32>
    %22 = vector.broadcast %21 : vector<1x32xf32> to vector<8x32xf32>
    %23 = arith.mulf %20, %22 : vector<8x32xf32>
    %c0_7 = arith.constant 0 : index
    %c0_8 = arith.constant 0 : index
    %24 = vector.load %arg3[%c0_7, %c0_8] : memref<1x32xf32, #tpu.memory_space<vmem>>, vector<1x32xf32>
    %25 = vector.broadcast %24 : vector<1x32xf32> to vector<8x32xf32>
    %26 = arith.addf %23, %25 : vector<8x32xf32>
    %27 = arith.truncf %26 : vector<8x32xf32> to vector<8x32xbf16>
    %c0_9 = arith.constant 0 : index
    %c0_10 = arith.constant 0 : index
    %28 = vector.load %arg4[%c0_9, %c0_10] : memref<32x128xbf16, #tpu.memory_space<vmem>>, vector<32x128xbf16>
    %cst_11 = arith.constant dense<0.000000e+00> : vector<8x128xf32>
    %29 = tpu.matmul %27, %28, %cst_11 {dimension_numbers = #tpu.dot_dimension_numbers<[1], [0], [0], [1], [0, 0, 1, 1], [], []>} : vector<8x32xbf16>, vector<32x128xbf16>, vector<8x128xf32> -> vector<8x128xf32>
    %c0_12 = arith.constant 0 : index
    %c0_13 = arith.constant 0 : index
    %30 = vector.load %arg5[%c0_12, %c0_13] : memref<1x128xf32, #tpu.memory_space<vmem>>, vector<1x128xf32>
    %31 = vector.broadcast %30 : vector<1x128xf32> to vector<8x128xf32>
    %32 = arith.addf %29, %31 : vector<8x128xf32>
    %cst_14 = arith.constant 5.000000e-01 : f32
    %33 = vector.broadcast %cst_14 : f32 to vector<8x128xf32>
    %34 = arith.mulf %33, %32 : vector<8x128xf32>
    %cst_15 = arith.constant 0.707106769 : f32
    %35 = vector.broadcast %cst_15 : f32 to vector<8x128xf32>
    %36 = arith.mulf %32, %35 : vector<8x128xf32>
    %37 = math.erf %36 : vector<8x128xf32>
    %cst_16 = arith.constant 1.000000e+00 : f32
    %38 = vector.broadcast %cst_16 : f32 to vector<8x128xf32>
    %39 = arith.addf %38, %37 : vector<8x128xf32>
    %40 = arith.mulf %34, %39 : vector<8x128xf32>
    %41 = arith.truncf %40 : vector<8x128xf32> to vector<8x128xbf16>
    %c0_17 = arith.constant 0 : index
    %c0_18 = arith.constant 0 : index
    %42 = vector.load %arg6[%c0_17, %c0_18] : memref<128x32xbf16, #tpu.memory_space<vmem>>, vector<128x32xbf16>
    %cst_19 = arith.constant dense<0.000000e+00> : vector<8x32xf32>
    %43 = tpu.matmul %41, %42, %cst_19 {dimension_numbers = #tpu.dot_dimension_numbers<[1], [0], [0], [1], [0, 0, 1, 1], [], []>} : vector<8x128xbf16>, vector<128x32xbf16>, vector<8x32xf32> -> vector<8x32xf32>
    %c0_20 = arith.constant 0 : index
    %c0_21 = arith.constant 0 : index
    %44 = vector.load %arg7[%c0_20, %c0_21] : memref<1x32xf32, #tpu.memory_space<vmem>>, vector<1x32xf32>
    %45 = vector.broadcast %44 : vector<1x32xf32> to vector<8x32xf32>
    %46 = arith.addf %43, %45 : vector<8x32xf32>
    %c0_22 = arith.constant 0 : index
    %c0_23 = arith.constant 0 : index
    %47 = vector.load %arg8[%c0_22, %c0_23] : memref<8x32xf32, #tpu.memory_space<vmem>>, vector<8x32xf32>
    tpu.vector_store %arg8[%c0_22, %c0_23], %46 {strides = array<i32>} : memref<8x32xf32, #tpu.memory_space<vmem>>, vector<8x32xf32>,
    return
  }
  func.func @transform_0(%arg0: i32) -> (i32, i32) {
    %c0_i32 = arith.constant 0 : i32
    %c0_i32_0 = arith.constant 0 : i32
    return %arg0, %c0_i32 : i32, i32
  }
  func.func @transform_1(%arg0: i32) -> (i32, i32) {
    %c0_i32 = arith.constant 0 : i32
    %c0_i32_0 = arith.constant 0 : i32
    %c0_i32_1 = arith.constant 0 : i32
    return %c0_i32, %c0_i32_0 : i32, i32
  }
  func.func @transform_2(%arg0: i32) -> (i32, i32) {
    %c0_i32 = arith.constant 0 : i32
    %c0_i32_0 = arith.constant 0 : i32
    %c0_i32_1 = arith.constant 0 : i32
    return %c0_i32, %c0_i32_0 : i32, i32
  }
  func.func @transform_3(%arg0: i32) -> (i32, i32) {
    %c0_i32 = arith.constant 0 : i32
    %c0_i32_0 = arith.constant 0 : i32
    %c0_i32_1 = arith.constant 0 : i32
    return %c0_i32, %c0_i32_0 : i32, i32
  }
  func.func @transform_4(%arg0: i32) -> (i32, i32) {
    %c0_i32 = arith.constant 0 : i32
    %c0_i32_0 = arith.constant 0 : i32
    %c0_i32_1 = arith.constant 0 : i32
    return %c0_i32, %c0_i32_0 : i32, i32
  }
  func.func @transform_5(%arg0: i32) -> (i32, i32) {
    %c0_i32 = arith.constant 0 : i32
    %c0_i32_0 = arith.constant 0 : i32
    %c0_i32_1 = arith.constant 0 : i32
    return %c0_i32, %c0_i32_0 : i32, i32
  }
  func.func @transform_6(%arg0: i32) -> (i32, i32) {
    %c0_i32 = arith.constant 0 : i32
    %c0_i32_0 = arith.constant 0 : i32
    %c0_i32_1 = arith.constant 0 : i32
    return %c0_i32, %c0_i32_0 : i32, i32
  }
  func.func @transform_7(%arg0: i32) -> (i32, i32) {
    %c0_i32 = arith.constant 0 : i32
    %c0_i32_0 = arith.constant 0 : i32
    return %arg0, %c0_i32 : i32, i32
  }
}

</mosaic_0001>

<bundles_post_ra>
// kernel: tpu_custom_call.1
= control target key start
LH: loop header
LB: loop body
LE: loop exit
PB: predicated region body
PF: predicated region fallthrough
CT: control target
= control target key end

     0   :  { %12 = vsyncpa [#allocation3], 0  ;;  %s938_s0 = inlined_call_operand.vmem [shape: f32[16,32], index: 0, kind: input, shape index: {}]   ;;  %s939_s1 = inlined_call_operand.vmem [shape: f32[1,32], index: 1, kind: input, shape index: {}]   ;;  %s940_s2 = inlined_call_operand.vmem [shape: f32[1,32], index: 2, kind: input, shape index: {}]   ;;  %s941_s3 = inlined_call_operand.vmem [shape: bf16[32,128], index: 3, kind: input, shape index: {}]   ;;  %s942_s4 = inlined_call_operand.vmem [shape: f32[1,128], index: 4, kind: input, shape index: {}]   ;;  %s943_s5 = inlined_call_operand.vmem [shape: bf16[128,32], index: 5, kind: input, shape index: {}]   ;;  %s944_s6 = inlined_call_operand.vmem [shape: f32[1,32], index: 6, kind: input, shape index: {}]   ;;  %s945_s7 = inlined_call_operand.hbm [shape: f32[16,32], index: 7, kind: output, shape index: {}]  }
   0x1   :  { %14 = vsyncpa [#allocation3 + $0x1], 0  ;;  %s792_s24 = smov 0   ;;  %s794_s25 = smov 0  }
   0x2   :  { %s796_s26 = smov 0   ;;  %s798_s27 = smov 0  }
   0x3 LB: > { %s813_s28 = sadd.s32 4294967295, %s747_s27   ;;  %s565_s29 = sadd.s32 4294967294, %s747_s27   ;;  %s747_s27 = sphi %s798_s27, %s951_s27   ;;  %s743_s26 = sphi %s796_s26, %s950_s26   ;;  %s739_s25 = sphi %s794_s25, %s949_s25   ;;  %s735_s24 = sphi %s792_s24, %s948_s24  }
   0x4   : > { %s817_s30 = sadd.s32 1, %s747_s27   ;;  %s179_s8 = sadd.s32 1, %s743_s26 }
   0x5   : > { %s176_s9 = ssub.s32 %s747_s27, %s817_s30  ;;  %p189_p0 = scmp.ne.s32.totalorder %s743_s26, %s739_s25 }
   0x6   : > { %p177_p1 = scmp.eq.s32.totalorder %s176_s9, 0  ;;  %p190_p2 = scmp.eq.s32.totalorder %s813_s28, 1 }
   0x7   : > { %p195_p3 = scmp.ne.s32.totalorder %s739_s25, %s735_s24  ;;  %p196_p4 = scmp.eq.s32.totalorder %s565_s29, 1 }
   0x8   : > { %s828_s10 = scalar_select %p177_p1, %s743_s26, %s179_s8  }
   0x9   : > { %p830_p5 = por %p190_p2, %p189_p0  ;;  %p834_p6 = por %p196_p4, %p195_p3 }
   0xa   : > { %p568_p7 = scmp.ge.s32.totalorder %s747_s27, 1  ;;  %p239_p8 = scmp.lt.s32.totalorder %s747_s27, 3 }
   0xc   : > { %p240_p9 = pnand %p568_p7, %p239_p8 }
   0xd   : > { %p270_p10 = scmp.lt.s32.totalorder (!%p240_p9), %s813_s28, 1  ;;  %vm276_vm0 = vcmask (!%p240_p9), 261120   ;;  %v671_v7 = vld [vmem:[%s941_s3] sm:$0xff] (!%p240_p9)   ;;  %v749_v8 = vmov (!%p240_p9), 0.0   ;;  %v672_v9 = vld [vmem:[%s941_s3 + $0x8] sm:$0xff] (!%p240_p9)   ;;  %vm750_vm1 = vmmov (!%p240_p9), 0  }
   0xe   : > { %243 = sbr.rel (%p240_p9) target bundleno = 802 (0x322), region = 48  ;;  %602 = vmatprep.subr.bf16.mxu0 (!%p240_p9), %v749_v8  ;;  %610 = vmatprep.subr.bf16.mxu1 (!%p240_p9), %v749_v8  ;;  %v673_v10 = vld [vmem:[%s943_s5] sm:$0xff] (!%p240_p9)   ;;  %v674_v11 = vld [vmem:[%s943_s5 + $0x8] sm:$0xff] (!%p240_p9)   ;;  %v675_v12 = vld [vmem:[%s943_s5 + $0x10] sm:$0xff] (!%p240_p9)   ;;  %s267_s16 = sand.u32 (!%p240_p9), 1, %s739_s25  }
   0xf   : > { %603 = vmatpush3.bf16.msra.mxu0 (!%p240_p9), %v671_v7  ;;  %606 = vmatprep.mubr.msk.bf16.mxu0 (!%p240_p9), %vm750_vm1, %v749_v8  ;;  %v571_v17 = vld [vmem:[%s939_s1] ss:$0 sm:$0xff] (!%p240_p9)  ;;  %v676_v23 = vld [vmem:[%s943_s5 + $0x18] sm:$0xff] (!%p240_p9)   ;;  %v678_v25 = vld [vmem:[%s943_s5 + $0x28] sm:$0xff] (!%p240_p9)   ;;  %s587_s20 = sshll.u32 (!%p240_p9), %s813_s28, 7 }
  0x10   : > { %604 = vmatprep.subr.bf16.mxu0 (!%p240_p9), %v749_v8  ;;  %626 = vmatprep.mubr.msk.bf16.mxu1 (!%p240_p9), %vm750_vm1, %v749_v8  ;;  %v572_v19 = vld [vmem:[%s940_s2] ss:$0 sm:$0xff] (!%p240_p9)  ;;  %v679_v26 = vld [vmem:[%s943_s5 + $0x30] sm:$0xff] (!%p240_p9)   ;;  %v680_v27 = vld [vmem:[%s943_s5 + $0x38] sm:$0xff] (!%p240_p9)   ;;  %s895_s8 = scalar_lea.hbm (!%p240_p9), %s945_s7, %s587_s20 }
  0x11   : > { %611 = vmatpush3.bf16.msra.mxu1 (!%p240_p9), %v673_v10  ;;  %v677_v24 = vld [vmem:[%s943_s5 + $0x20] sm:$0xff] (!%p240_p9)  }
  0x12   : > { %612 = vmatprep.subr.bf16.mxu1 (!%p240_p9), %v749_v8  ;;  %v573_v28 = vld [vmem:[%s942_s4] ss:$0 sm:$0xff] (!%p240_p9) }
  0x13   : > { %605 = vmatpush3.bf16.msra.mxu0 (!%p240_p9), %v672_v9  ;;  %v577_v40 = vld [vmem:[%s944_s6] ss:$0 sm:$0xff] (!%p240_p9) }
  0x15   : > { %s271_s13 = scalar_select %p270_p10, %s813_s28, 1  ;;  %613 = vmatpush3.bf16.msra.mxu1 %v674_v11 }
  0x16   : > { %614 = vmatprep.subr.bf16.mxu1 %v749_v8  ;;  %s493_s28 = scalar_lea.sflag [#allocation3], %s267_s16 }
  0x17   : > { %s570_s14 = sshll.u32 %s271_s13, 3  ;;  %s751_s13 = smov [#allocation2]  }
  0x18   : > { %s273_s17 = scalar_lea.vmem %s938_s0, %s570_s14  ;;  %s689_s14 = sshll.u32 %s751_s13, 4  ;;  %s690_s14 = int_to_ptr.vmem [resolvable:$false] %s689_s14 }
  0x19   : > { %v275_v0 = vld [vmem:[%s273_s17] sm:$0xff]  ;;  %615 = vmatpush3.bf16.msra.mxu1 %v675_v12  ;;  %s569_s17 = sshll.u32 %s267_s16, 3  ;;  %s691_s15 = scalar_lea.vmem %s690_s14, 256 }
  0x1a   : > { %v277_v1 = vsel %vm276_vm0, %v275_v0, 0.0  ;;  %616 = vmatprep.subr.bf16.mxu1 %v749_v8  ;;  %s269_s21 = scalar_lea.vmem [#allocation2], %s569_s17 }
  0x1b   : > { %278 = vadd.xlane.f32.xlu0 %v277_v1  ;;  %s506_s22 = sshll.u32 %s269_s21, 4  ;;  %s897_s22 = int_to_ptr.vmem [resolvable:$true] %s506_s22 }
  0x1c   : > { %s685_s9 = scalar_lea.vmem %s897_s22, 128  ;;  %p692_p0 = scmp.lt.s32.totalorder %s897_s22, %s690_s14 }
  0x1d   : > { %617 = vmatpush3.bf16.msra.mxu1 %v676_v23  ;;  %p686_p11 = scmp.ne.s32.totalorder %s897_s22, %s685_s9  ;;  %p693_p1 = scmp.lt.s32.totalorder %s691_s15, %s685_s9 }
  0x1e   : > { %618 = vmatprep.subr.bf16.mxu1 %v749_v8 }
  0x1f   : > { %p687_p12 = pnand %p686_p11, %p830_p5  ;;  %p694_p2 = por %p693_p1, %p692_p0 }
  0x21   : > { %619 = vmatpush3.bf16.msra.mxu1 %v677_v24  ;;  %p688_p13 = pneg %p687_p12 }
  0x22   : > { %620 = vmatprep.subr.bf16.mxu1 %v749_v8 }
  0x23   : > { %p695_p3 = pnand %p694_p2, %p688_p13 }
  0x25   : > { %621 = vmatpush3.bf16.msra.mxu1 %v678_v25 }
  0x26   : > { %622 = vmatprep.subr.bf16.mxu1 %v749_v8 }
  0x29   : > { %623 = vmatpush3.bf16.msra.mxu1 %v679_v26 }
  0x2a   : > { %624 = vmatprep.subr.bf16.mxu1 %v749_v8 }
  0x2d   : > { %625 = vmatpush3.bf16.msra.mxu1 %v680_v27 }
  0xa8   : > { %v279_v2 = vpop.xlane.xlu0 %278 }
  0xa9   : > { %v281_v3 = vmul.f32 0.03125, %v279_v2 }
  0xab   : > { %v282_v4 = vsub.f32 %v275_v0, %v281_v3 }
  0xad   : > { %v283_v5 = vmul.f32 %v282_v4, %v282_v4 }
  0xaf   : > { %v284_v6 = vsel %vm276_vm0, %v283_v5, 0.0 }
  0xb0   : > { %285 = vadd.xlane.f32.xlu0 %v284_v6 }
 0x13d   : > { %v286_v13 = vpop.xlane.xlu0 %285 }
 0x13e   : > { %v287_v14 = vmul.f32 0.03125, %v286_v13 }
 0x140   : > { %v288_v15 = vadd.f32 1e-05, %v287_v14 }
 0x142   : > { %681 = vrsqrt.f32 %v288_v15 }
 0x14c   : > { %v682_v16 = vpop.eup %681 }
 0x14d   : > { %v290_v18 = vmul.f32 %v682_v16, %v282_v4 }
 0x14f   : > { %v298_v20 = vmul.f32 %v571_v17, %v290_v18 }
 0x151   : > { %v306_v21 = vadd.f32 %v572_v19, %v298_v20 }
 0x153   : > { %v307_v22 = vpack.c.bf16 %v306_v21, %v306_v21 }
 0x155   : > { %607 = vmatmul.mubr.msk.bf16.vlgmr.msra.gmra.mrb[0].mxu0 %vm276_vm0, %v307_v22 }
 0x228   : > { %v368_v29 = vpop.f32.mrb[0].mxu0 }
 0x229   : > { %v369_v30 = vadd.f32 %v573_v28, %v368_v29  ;;  %v608_v31 = vpop.f32.mrb[1].mxu0 }
 0x22a   : > { %v371_v32 = vpop.f32.mrb[2].mxu0 }
 0x22b   : > { %v375_v33 = vmul.f32 0.70710677, %v369_v30  ;;  %v609_v34 = vpop.f32.mrb[3].mxu0  ;;  %v374_v36 = vmul.f32 0.5, %v369_v30 }
 0x22d   : > { %683 = verf.f32 %v375_v33 }
 0x237   : > { %v684_v35 = vpop.eup %683 }
 0x238   : > { %v377_v37 = vadd.f32 1.0, %v684_v35 }
 0x23a   : > { %v378_v38 = vmul.f32 %v377_v37, %v374_v36 }
 0x23c   : > { %v379_v39 = vpack.c.bf16 %v378_v38, %v378_v38 }
 0x23e   : > { %627 = vmatmul.mubr.bf16.vlgmr.msra.gmra.mrb[0].mxu1 %v379_v39 }
 0x311   : > { %v485_v41 = vpop.f32.mrb[0].mxu1 }
 0x312   : > { %v486_v42 = vadd.f32 %v577_v40, %v485_v41  ;;  %v628_v43 = vpop.f32.mrb[1].mxu1 }
 0x313   : > { %v488_v44 = vpop.f32.mrb[2].mxu1 }
 0x314   : > { %v629_v45 = vpop.f32.mrb[3].mxu1  ;;  %491 = vst.msk [vmem:[%s269_s21] sm:$0xff] %vm276_vm0, %v486_v42 }
 0x315   : > { %698 = shalt.err (!%p695_p3)
}
 0x316   : > { %s699_s16 = scalar_lea.hbm %s895_s8, 128  ;;  %s703_s19 = scalar_lea.hbm %s945_s7, 256 }
 0x317   : > { %p700_p4 = scmp.ne.s32.totalorder %s895_s8, %s699_s16  ;;  %p704_p9 = scmp.lt.u32.totalorder %s895_s8, %s945_s7 }
 0x318   : > { %p705_p10 = scmp.lt.u32.totalorder %s703_s19, %s699_s16  ;;  %p707_p12 = scmp.lt.u32.totalorder %s699_s16, %s895_s8 }
 0x319   : > { %p701_p7 = pnand %p700_p4, %p830_p5 }
 0x31a   : > { %p706_p11 = por %p705_p10, %p704_p9 }
 0x31b   : > { %p702_p8 = pneg %p701_p7 }
 0x31c   : > { %p708_p13 = por %p707_p12, %p706_p11 }
 0x31e   : > { %p709_p0 = pnand %p708_p13, %p702_p8 }
 0x320   : > { %712 = shalt.err (!%p709_p0)
}
 0x321   : > { %630 = dma.vmem_to_hbm [thread:$0]  (%p830_p5), %s897_s22, 128, %s895_s8, %s493_s28  }
 0x322 PF: > { %p636_p1 = scmp.ge.s32.totalorder %s747_s27, 2  ;;  %s518_s23 = sand.u32 1, %s735_s24  }
 0x323   : > { %s519_s29 = scalar_lea.sflag [#allocation3], %s518_s23 }
 0x324   : > { %p633_p2 = pnand %p636_p1, %p834_p6 }
 0x326   : > { %730 = dma.done.wait (!%p633_p2), %s519_s29, 128  }
 0x327   : > { %732 = vsyncadd (!%p633_p2), %s519_s29, 4294967168  ;;  %p17_p3 = scmp.ge.s32.totalorder %s817_s30, 4   ;;  %s948_s24 = smov %s739_s25 }
 0x328   : > { %s949_s25 = smov %s743_s26  ;;  %s950_s26 = smov %s828_s10 }
 0x329   : > { %s951_s27 = smov %s817_s30  ;;  %19 = sbr.rel (!%p17_p3) target bundleno = 3 (0x3), region = 83 }
 0x330   :  { %524 = vsyncpa [#allocation3], 1 }
 0x331   :  { %526 = vsyncpa [#allocation3 + $0x1], 1 }

</bundles_post_ra>
